<compile_context>
chip_gen: v7x
topology: tpu7x:2x2x1
jax: 0.10.0
libtpu: 0.0.40
codegen_flags: <defaults>
</compile_context>

<pallas_src>
import jax
import jax.numpy as jnp
from jax import lax
from jax.experimental import pallas as pl
from jax.experimental.pallas import tpu as pltpu


def _round_up(x, m):
    return ((x + m - 1) // m) * m


def _vq_kernel(idx_ref, wt_ref, z_ref, zq_ref, cs_ref, err_ref, cs_acc, err_acc):
    """Per-(batch, token-tile) step: gather + count / error accumulation."""
    j = pl.program_id(1)

    # Reset per-batch scratch accumulators at the first token tile.
    @pl.when(j == 0)
    def _():
        cs_acc[...] = jnp.zeros_like(cs_acc)
        err_acc[...] = jnp.zeros_like(err_acc)

    idx = idx_ref[...]                                   # (1, T) int32 (-1 = pad)
    k = wt_ref.shape[1]
    t = idx.shape[1]

    # Transposed one-hot: onehot_t[k, t] = (k == idx[t]); idx = -1 -> all-zero col.
    row_iota = lax.broadcasted_iota(jnp.int32, (k, t), 0)
    onehot_t = (row_iota == idx).astype(jnp.float32)     # (K, T)

    # Gather as an MXU matmul, channel-major: (D, K) @ (K, T) -> (D, T).
    # Exactly one nonzero per column -> bit-exact f32 gather. Lane axis = tokens.
    zq_t = jnp.dot(wt_ref[...], onehot_t, preferred_element_type=jnp.float32)
    zq_ref[...] = zq_t.astype(zq_ref.dtype)

    # Per-step lane (XLU) reductions into tiny accumulators (hide under the MXU).
    cs_acc[...] += jnp.sum(onehot_t, axis=1, keepdims=True)                 # (K, 1)

    valid = idx >= 0                                                        # (1, T)
    diff = zq_t - z_ref[...].astype(jnp.float32)
    sq = jnp.where(valid, diff * diff, 0.0)              # mask OOB / padded columns
    err_acc[...] += jnp.sum(sq, axis=1, keepdims=True)                      # (D, 1)

    # Finalize once per batch.
    @pl.when(j == pl.num_programs(1) - 1)
    def _():
        cs_ref[...] = cs_acc[...]                                           # (K, 1)
        err_ref[...] = jnp.sum(err_acc[...], axis=0, keepdims=True)         # (1, 1)


def _embed_kernel(idx_ref, wt_ref, zq_ref, cs_ref, cs_acc):
    """Pure EmbeddingEMA.forward path (no z, no error accumulation)."""
    j = pl.program_id(1)

    @pl.when(j == 0)
    def _():
        cs_acc[...] = jnp.zeros_like(cs_acc)

    idx = idx_ref[...]                                   # (1, T) int32
    k = wt_ref.shape[1]
    t = idx.shape[1]

    row_iota = lax.broadcasted_iota(jnp.int32, (k, t), 0)
    onehot_t = (row_iota == idx).astype(jnp.float32)     # (K, T)

    zq_t = jnp.dot(wt_ref[...], onehot_t, preferred_element_type=jnp.float32)
    zq_ref[...] = zq_t.astype(zq_ref.dtype)

    cs_acc[...] += jnp.sum(onehot_t, axis=1, keepdims=True)                 # (K, 1)

    @pl.when(j == pl.num_programs(1) - 1)
    def _():
        cs_ref[...] = cs_acc[...]


def vector_quantizer_forward(bhw, encoding_indices, z, weight, cluster_size_buf,
                             *, beta, decay=0.0, tile_hw=1024):
    """Pallas implementation of the VQ / EmbeddingEMA forward (eval mode).

    Args:
      bhw: (B, H, W) python ints.
      encoding_indices: int32 array, shape (N,) with N = B*H*W (b, h, w order).
      z: array in NCHW (B, C, H, W) in any float dtype, or None (embedding-only).
      weight: codebook, shape (n_embed, embedding_dim).
      cluster_size_buf: running cluster-size buffer, shape (n_embed,).

    Returns:
      z_q (B, C, H, W) float32, loss scalar, encoding_indices, updated cluster_size.
    """
    b, h, w = bhw
    hw = h * w
    n = b * hw
    k, d = weight.shape

    # --- token tile: always a multiple of 128 -> lane-dense in-kernel stores ---
    if hw <= tile_hw:
        tile = _round_up(hw, 128)
    else:
        tile = max((tile_hw // 128) * 128, 128)
    hw_pad = _round_up(hw, tile)
    n_tiles = hw_pad // tile

    # Indices are tiny: pad them with -1 (all-zero one-hot column) up to hw_pad.
    idx = encoding_indices.astype(jnp.int32).reshape(b, 1, hw)
    if hw_pad != hw:
        idx = jnp.pad(idx, ((0, 0), (0, 0), (0, hw_pad - hw)), constant_values=-1)

    w_t = jnp.asarray(weight, jnp.float32).T             # (D, K) channel-major codebook

    grid = (b, n_tiles)
    idx_spec = pl.BlockSpec((None, 1, tile), lambda bi, j: (bi, 0, j))
    # Resident codebook: whole array in VMEM, single-buffered (no pipelining).
    wt_spec = pl.BlockSpec(memory_space=pltpu.MemorySpace.VMEM)
    tok_spec = pl.BlockSpec((None, d, tile), lambda bi, j: (bi, 0, j))
    cs_spec = pl.BlockSpec((None, k, 1), lambda bi, j: (bi, 0, 0))
    err_spec = pl.BlockSpec((None, 1, 1), lambda bi, j: (bi, 0, 0))

    z_bytes = 4 if z is None else jnp.dtype(z.dtype).itemsize
    est = (d * k * 4                       # resident codebook (single buffer)
           + 2 * tile * 4                  # idx blocks (double buffered)
           + 2 * d * tile * z_bytes        # z input blocks
           + 2 * d * tile * 4              # z_q output blocks
           + k * tile * 4                  # one-hot temporary
           + (k + d) * 4                   # scratch accumulators
           + 2 * (k + 1) * 4)              # count / error output blocks
    vmem_limit = int(min(max(2 * est + (2 << 20), 16 << 20), 64 << 20))
    cparams = pltpu.CompilerParams(
        dimension_semantics=("parallel", "arbitrary"),
        vmem_limit_bytes=vmem_limit)

    if z is not None:
        # Native dtype, channel-major view; NO astype / pad HBM passes.
        z_flat = z.reshape(b, d, hw)

        zq_nc, cs_part, err_part = pl.pallas_call(
            _vq_kernel,
            out_shape=(
                jax.ShapeDtypeStruct((b, d, hw), jnp.float32),   # z_q, channel-major
                jax.ShapeDtypeStruct((b, k, 1), jnp.float32),    # per-batch counts
                jax.ShapeDtypeStruct((b, 1, 1), jnp.float32),    # per-batch sq. error
            ),
            grid_spec=pltpu.PrefetchScalarGridSpec(
                num_scalar_prefetch=0,
                grid=grid,
                in_specs=[idx_spec, wt_spec, tok_spec],
                out_specs=[tok_spec, cs_spec, err_spec],
                scratch_shapes=[
                    pltpu.VMEM((k, 1), jnp.float32),   # per-batch count accumulator
                    pltpu.VMEM((d, 1), jnp.float32),   # per-batch sq-error accumulator
                ],
            ),
            compiler_params=cparams,
        )(idx, w_t, z_flat)
        loss = beta * jnp.sum(err_part) / jnp.float32(n * d)   # F.mse_loss mean reduction
    else:
        # Pure EmbeddingEMA.forward: no z DMA, no error path.
        zq_nc, cs_part = pl.pallas_call(
            _embed_kernel,
            out_shape=(
                jax.ShapeDtypeStruct((b, d, hw), jnp.float32),
                jax.ShapeDtypeStruct((b, k, 1), jnp.float32),
            ),
            grid_spec=pltpu.PrefetchScalarGridSpec(
                num_scalar_prefetch=0,
                grid=grid,
                in_specs=[idx_spec, wt_spec],
                out_specs=[tok_spec, cs_spec],
                scratch_shapes=[pltpu.VMEM((k, 1), jnp.float32)],
            ),
            compiler_params=cparams,
        )(idx, w_t)
        loss = jnp.float32(0.0)

    # Already NCHW and un-padded: plain reshape, no slice / transpose HBM pass.
    z_q = zq_nc.reshape(b, d, h, w)

    # ema_inplace(cluster_size, encodings.sum(0), decay)
    counts = jnp.sum(cs_part[:, :, 0], axis=0)                 # (K,)
    new_cluster_size = cluster_size_buf * decay + (1.0 - decay) * counts

    return z_q, loss, encoding_indices, new_cluster_size


def make_codebook(key, n_embed, embedding_dim):
    # EmbeddingEMA with kmeans_init=False: weight = l2norm(randn(n_embed, dim))
    w = jax.random.normal(key, (n_embed, embedding_dim), jnp.float32)
    w = w / jnp.sqrt(jnp.sum(w * w, axis=-1, keepdims=True) + 1e-12)
    return w


if __name__ == "__main__":
    key = jax.random.PRNGKey(0)
    k_w, k_idx, k_z, k_idx3, k_z3 = jax.random.split(key, 5)

    # ---- test 1: VQ forward with z (loss + counts); H*W = 64 < 128 (padded tile) ----
    B, H, W = 2, 8, 8
    n_embed, embedding_dim, beta = 128, 32, 0.25
    N = B * H * W

    weight = make_codebook(k_w, n_embed, embedding_dim)
    cluster_size_buf = jnp.zeros((n_embed,), jnp.float32)
    encoding_indices = jax.random.randint(k_idx, (N,), 0, n_embed, dtype=jnp.int32)
    z = jax.random.normal(k_z, (B, embedding_dim, H, W), jnp.float32)   # NCHW

    z_q, loss, idx_out, new_cs = vector_quantizer_forward(
        (B, H, W), encoding_indices, z, weight, cluster_size_buf, beta=beta)
    jax.block_until_ready((z_q, loss, idx_out, new_cs))

    gathered = weight[encoding_indices]                                  # (N, D)
    zq_ref = gathered.reshape(B, H, W, embedding_dim).transpose(0, 3, 1, 2)
    z_bhwc = jnp.transpose(z, (0, 2, 3, 1))
    loss_ref = beta * jnp.mean((gathered.reshape(B, H, W, embedding_dim) - z_bhwc) ** 2)
    cs_ref = jnp.sum(jax.nn.one_hot(encoding_indices, n_embed, dtype=jnp.float32), axis=0)

    assert jnp.allclose(z_q, zq_ref, atol=1e-5), "z_q mismatch"
    assert jnp.allclose(loss, loss_ref, atol=1e-5), "loss mismatch"
    assert jnp.allclose(new_cs, cs_ref, atol=1e-5), "cluster_size mismatch"

    # ---- test 2: EmbeddingEMA.forward alone (z=None path, no error DMA) ----
    z_q2, loss2, _, cs2 = vector_quantizer_forward(
        (B, H, W), encoding_indices, None, weight, cluster_size_buf, beta=beta)
    jax.block_until_ready((z_q2, loss2, cs2))
    assert jnp.allclose(z_q2, zq_ref, atol=1e-5), "embedding-only z_q mismatch"
    assert float(loss2) == 0.0, "embedding-only loss should be 0"
    assert jnp.allclose(cs2, cs_ref, atol=1e-5), "embedding-only cluster_size mismatch"

    # ---- test 3: multi-tile + partial last tile (H*W=192, tile=128 -> masked tail) ----
    B3, H3, W3 = 2, 16, 12
    N3 = B3 * H3 * W3
    idx3 = jax.random.randint(k_idx3, (N3,), 0, n_embed, dtype=jnp.int32)
    z3 = jax.random.normal(k_z3, (B3, embedding_dim, H3, W3), jnp.float32)
    z_q3, loss3, _, cs3 = vector_quantizer_forward(
        (B3, H3, W3), idx3, z3, weight, cluster_size_buf, beta=beta, tile_hw=128)
    jax.block_until_ready((z_q3, loss3, cs3))

    g3 = weight[idx3]
    zq3_ref = g3.reshape(B3, H3, W3, embedding_dim).transpose(0, 3, 1, 2)
    loss3_ref = beta * jnp.mean(
        (g3.reshape(B3, H3, W3, embedding_dim) - jnp.transpose(z3, (0, 2, 3, 1))) ** 2)
    cs3_ref = jnp.sum(jax.nn.one_hot(idx3, n_embed, dtype=jnp.float32), axis=0)
    assert jnp.allclose(z_q3, zq3_ref, atol=1e-5), "padded z_q mismatch"
    assert jnp.allclose(loss3, loss3_ref, atol=1e-5), "padded loss mismatch"
    assert jnp.allclose(cs3, cs3_ref, atol=1e-5), "padded cluster_size mismatch"

    print("KERNEL_OK")
</pallas_src>

<mosaic_0001>
module attributes {stable_mosaic.version = 11 : i64} {
  func.func @_vq_kernel(%arg0: i32, %arg1: i32, %arg2: memref<1x1x128xi32, #tpu.memory_space<vmem>>, %arg3: memref<32x128xf32, #tpu.memory_space<vmem>>, %arg4: memref<1x32x128xf32, #tpu.memory_space<vmem>>, %arg5: memref<1x32x128xf32, #tpu.memory_space<vmem>>, %arg6: memref<1x128x1xf32, #tpu.memory_space<vmem>>, %arg7: memref<1x1x1xf32, #tpu.memory_space<vmem>>, %arg8: memref<128x1xf32, #tpu.memory_space<vmem>>, %arg9: memref<32x1xf32, #tpu.memory_space<vmem>>) attributes {dimension_semantics = [#tpu.dimension_semantics<parallel>, #tpu.dimension_semantics<arbitrary>], iteration_bounds = array<i64: 2, 1>, scalar_prefetch = 0 : i64, scratch_operands = 2 : i64, tpu.core_type = #tpu.core_type<tc>, window_params = [{transform_indices = @transform_0, window_bounds = array<i64: 1, 1, 128>}, {pipeline_mode = #tpu.pipeline_mode<synchronous>, transform_indices = @transform_1, window_bounds = array<i64: 32, 128>}, {transform_indices = @transform_2, window_bounds = array<i64: 1, 32, 128>}, {transform_indices = @transform_3, window_bounds = array<i64: 1, 32, 128>}, {transform_indices = @transform_4, window_bounds = array<i64: 1, 128, 1>}, {transform_indices = @transform_5, window_bounds = array<i64: 1, 1, 1>}]} {
    %c0_i32 = arith.constant 0 : i32
    %0 = arith.cmpi eq, %arg1, %c0_i32 : i32
    %1 = arith.extui %0 : i1 to i32
    %c0_i32_0 = arith.constant 0 : i32
    %2 = arith.cmpi ne, %1, %c0_i32_0 : i32
    scf.if %2 {
      %cst_25 = arith.constant 0.000000e+00 : f32
      %38 = vector.broadcast %cst_25 : f32 to vector<128x1xf32>
      %c0_26 = arith.constant 0 : index
      %c0_27 = arith.constant 0 : index
      %39 = vector.load %arg8[%c0_26, %c0_27] : memref<128x1xf32, #tpu.memory_space<vmem>>, vector<128x1xf32>
      tpu.vector_store %arg8[%c0_26, %c0_27], %38 {strides = array<i32>} : memref<128x1xf32, #tpu.memory_space<vmem>>, vector<128x1xf32>,
      %cst_28 = arith.constant 0.000000e+00 : f32
      %40 = vector.broadcast %cst_28 : f32 to vector<32x1xf32>
      %c0_29 = arith.constant 0 : index
      %c0_30 = arith.constant 0 : index
      %41 = vector.load %arg9[%c0_29, %c0_30] : memref<32x1xf32, #tpu.memory_space<vmem>>, vector<32x1xf32>
      tpu.vector_store %arg9[%c0_29, %c0_30], %40 {strides = array<i32>} : memref<32x1xf32, #tpu.memory_space<vmem>>, vector<32x1xf32>,
    } else {
    }
    %c0 = arith.constant 0 : index
    %c0_1 = arith.constant 0 : index
    %c0_2 = arith.constant 0 : index
    %3 = vector.load %arg2[%c0, %c0_1, %c0_2] : memref<1x1x128xi32, #tpu.memory_space<vmem>>, vector<1x1x128xi32>
    %4 = vector.shape_cast %3 : vector<1x1x128xi32> to vector<1x128xi32>
    %5 = tpu.iota {dimensions = array<i32: 0>} : vector<128x128xi32>
    %6 = vector.broadcast %4 : vector<1x128xi32> to vector<128x128xi32>
    %7 = arith.cmpi eq, %5, %6 : vector<128x128xi32>
    %8 = arith.extui %7 : vector<128x128xi1> to vector<128x128xi32>
    %9 = arith.sitofp %8 : vector<128x128xi32> to vector<128x128xf32>
    %c0_3 = arith.constant 0 : index
    %c0_4 = arith.constant 0 : index
    %10 = vector.load %arg3[%c0_3, %c0_4] : memref<32x128xf32, #tpu.memory_space<vmem>>, vector<32x128xf32>
    %cst = arith.constant dense<0.000000e+00> : vector<32x128xf32>
    %11 = tpu.matmul %10, %9, %cst {dimension_numbers = #tpu.dot_dimension_numbers<[1], [0], [0], [1], [0, 0, 1, 1], [], []>} : vector<32x128xf32>, vector<128x128xf32>, vector<32x128xf32> -> vector<32x128xf32>
    %c0_5 = arith.constant 0 : index
    %c0_6 = arith.constant 0 : index
    %c0_7 = arith.constant 0 : index
    %12 = vector.load %arg5[%c0_5, %c0_6, %c0_7] : memref<1x32x128xf32, #tpu.memory_space<vmem>>, vector<1x32x128xf32>
    %13 = vector.shape_cast %12 : vector<1x32x128xf32> to vector<32x128xf32>
    %14 = vector.shape_cast %11 : vector<32x128xf32> to vector<1x32x128xf32>
    tpu.vector_store %arg5[%c0_5, %c0_6, %c0_7], %14 {strides = array<i32>} : memref<1x32x128xf32, #tpu.memory_space<vmem>>, vector<1x32x128xf32>,
    %c0_8 = arith.constant 0 : index
    %c0_9 = arith.constant 0 : index
    %15 = vector.load %arg8[%c0_8, %c0_9] : memref<128x1xf32, #tpu.memory_space<vmem>>, vector<128x1xf32>
    %cst_10 = arith.constant dense<0.000000e+00> : vector<128xf32>
    %16 = vector.multi_reduction <add>, %9, %cst_10 [1] : vector<128x128xf32> to vector<128xf32>
    %17 = vector.shape_cast %16 : vector<128xf32> to vector<128x1xf32>
    %18 = arith.addf %15, %17 : vector<128x1xf32>
    %c0_11 = arith.constant 0 : index
    %c0_12 = arith.constant 0 : index
    %19 = vector.load %arg8[%c0_11, %c0_12] : memref<128x1xf32, #tpu.memory_space<vmem>>, vector<128x1xf32>
    tpu.vector_store %arg8[%c0_11, %c0_12], %18 {strides = array<i32>} : memref<128x1xf32, #tpu.memory_space<vmem>>, vector<128x1xf32>,
    %c0_i32_13 = arith.constant 0 : i32
    %20 = vector.broadcast %c0_i32_13 : i32 to vector<1x128xi32>
    %21 = arith.cmpi sge, %4, %20 : vector<1x128xi32>
    %c0_14 = arith.constant 0 : index
    %c0_15 = arith.constant 0 : index
    %c0_16 = arith.constant 0 : index
    %22 = vector.load %arg4[%c0_14, %c0_15, %c0_16] : memref<1x32x128xf32, #tpu.memory_space<vmem>>, vector<1x32x128xf32>
    %23 = vector.shape_cast %22 : vector<1x32x128xf32> to vector<32x128xf32>
    %24 = arith.subf %11, %23 : vector<32x128xf32>
    %25 = arith.mulf %24, %24 : vector<32x128xf32>
    %cst_17 = arith.constant 0.000000e+00 : f32
    %26 = vector.shape_cast %21 : vector<1x128xi1> to vector<1x128xi1>
    %27 = vector.broadcast %26 : vector<1x128xi1> to vector<32x128xi1>
    %28 = vector.broadcast %cst_17 : f32 to vector<32x128xf32>
    %29 = arith.select %27, %25, %28 : vector<32x128xi1>, vector<32x128xf32>
    %c0_18 = arith.constant 0 : index
    %c0_19 = arith.constant 0 : index
    %30 = vector.load %arg9[%c0_18, %c0_19] : memref<32x1xf32, #tpu.memory_space<vmem>>, vector<32x1xf32>
    %cst_20 = arith.constant dense<0.000000e+00> : vector<32xf32>
    %31 = vector.multi_reduction <add>, %29, %cst_20 [1] : vector<32x128xf32> to vector<32xf32>
    %32 = vector.shape_cast %31 : vector<32xf32> to vector<32x1xf32>
    %33 = arith.addf %30, %32 : vector<32x1xf32>
    %c0_21 = arith.constant 0 : index
    %c0_22 = arith.constant 0 : index
    %34 = vector.load %arg9[%c0_21, %c0_22] : memref<32x1xf32, #tpu.memory_space<vmem>>, vector<32x1xf32>
    tpu.vector_store %arg9[%c0_21, %c0_22], %33 {strides = array<i32>} : memref<32x1xf32, #tpu.memory_space<vmem>>, vector<32x1xf32>,
    %c0_i32_23 = arith.constant 0 : i32
    %35 = arith.cmpi eq, %arg1, %c0_i32_23 : i32
    %36 = arith.extui %35 : i1 to i32
    %c0_i32_24 = arith.constant 0 : i32
    %37 = arith.cmpi ne, %36, %c0_i32_24 : i32
    scf.if %37 {
      %c0_25 = arith.constant 0 : index
      %c0_26 = arith.constant 0 : index
      %38 = vector.load %arg8[%c0_25, %c0_26] : memref<128x1xf32, #tpu.memory_space<vmem>>, vector<128x1xf32>
      %c0_27 = arith.constant 0 : index
      %c0_28 = arith.constant 0 : index
      %c0_29 = arith.constant 0 : index
      %39 = vector.load %arg6[%c0_27, %c0_28, %c0_29] : memref<1x128x1xf32, #tpu.memory_space<vmem>>, vector<1x128x1xf32>
      %40 = vector.shape_cast %39 : vector<1x128x1xf32> to vector<128x1xf32>
      %41 = vector.shape_cast %38 : vector<128x1xf32> to vector<1x128x1xf32>
      tpu.vector_store %arg6[%c0_27, %c0_28, %c0_29], %41 {strides = array<i32>} : memref<1x128x1xf32, #tpu.memory_space<vmem>>, vector<1x128x1xf32>,
      %c0_30 = arith.constant 0 : index
      %c0_31 = arith.constant 0 : index
      %42 = vector.load %arg9[%c0_30, %c0_31] : memref<32x1xf32, #tpu.memory_space<vmem>>, vector<32x1xf32>
      %cst_32 = arith.constant dense<0.000000e+00> : vector<1xf32>
      %43 = vector.multi_reduction <add>, %42, %cst_32 [0] : vector<32x1xf32> to vector<1xf32>
      %44 = vector.shape_cast %43 : vector<1xf32> to vector<1x1xf32>
      %c0_33 = arith.constant 0 : index
      %c0_34 = arith.constant 0 : index
      %c0_35 = arith.constant 0 : index
      %45 = vector.load %arg7[%c0_33, %c0_34, %c0_35] : memref<1x1x1xf32, #tpu.memory_space<vmem>>, vector<1x1x1xf32>
      %46 = vector.shape_cast %45 : vector<1x1x1xf32> to vector<1x1xf32>
      %47 = vector.shape_cast %44 : vector<1x1xf32> to vector<1x1x1xf32>
      tpu.vector_store %arg7[%c0_33, %c0_34, %c0_35], %47 {strides = array<i32>} : memref<1x1x1xf32, #tpu.memory_space<vmem>>, vector<1x1x1xf32>,
    } else {
    }
    return
  }
  func.func @transform_0(%arg0: i32, %arg1: i32) -> (i32, i32, i32) {
    %c0_i32 = arith.constant 0 : i32
    %c0_i32_0 = arith.constant 0 : i32
    return %arg0, %c0_i32, %arg1 : i32, i32, i32
  }
  func.func @transform_1(%arg0: i32, %arg1: i32) -> (i32, i32) {
    %c0_i32 = arith.constant 0 : i32
    %c0_i32_0 = arith.constant 0 : i32
    %c0_i32_1 = arith.constant 0 : i32
    return %c0_i32, %c0_i32_0 : i32, i32
  }
  func.func @transform_2(%arg0: i32, %arg1: i32) -> (i32, i32, i32) {
    %c0_i32 = arith.constant 0 : i32
    %c0_i32_0 = arith.constant 0 : i32
    return %arg0, %c0_i32, %arg1 : i32, i32, i32
  }
  func.func @transform_3(%arg0: i32, %arg1: i32) -> (i32, i32, i32) {
    %c0_i32 = arith.constant 0 : i32
    %c0_i32_0 = arith.constant 0 : i32
    return %arg0, %c0_i32, %arg1 : i32, i32, i32
  }
  func.func @transform_4(%arg0: i32, %arg1: i32) -> (i32, i32, i32) {
    %c0_i32 = arith.constant 0 : i32
    %c0_i32_0 = arith.constant 0 : i32
    %c0_i32_1 = arith.constant 0 : i32
    return %arg0, %c0_i32, %c0_i32_0 : i32, i32, i32
  }
  func.func @transform_5(%arg0: i32, %arg1: i32) -> (i32, i32, i32) {
    %c0_i32 = arith.constant 0 : i32
    %c0_i32_0 = arith.constant 0 : i32
    %c0_i32_1 = arith.constant 0 : i32
    return %arg0, %c0_i32, %c0_i32_0 : i32, i32, i32
  }
}

</mosaic_0001>

<bundles_post_ra>
// kernel: tpu_custom_call.1
= control target key start
LH: loop header
LB: loop body
LE: loop exit
PB: predicated region body
PF: predicated region fallthrough
CT: control target
= control target key end

     0   :  { %s1988_s0 = inlined_call_operand.hbm [shape: s32[2,1,128], index: 0, kind: input, shape index: {}]   ;;  %s1989_s1 = inlined_call_operand.hbm [shape: f32[32,128], index: 1, kind: input, shape index: {}]   ;;  %s1990_s2 = inlined_call_operand.hbm [shape: f32[2,32,64], index: 2, kind: input, shape index: {}]   ;;  %s1991_s3 = inlined_call_operand.hbm [shape: f32[2,32,64], index: 3, kind: output, shape index: {0}]   ;;  %s1992_s4 = inlined_call_operand.vmem [shape: f32[2,128,1], index: 4, kind: output, shape index: {1}]   ;;  %s1993_s5 = inlined_call_operand.vmem [shape: f32[2,1,1], index: 5, kind: output, shape index: {2}]  }
   0x1   :  { %2000 = sst [smem:[#allocation17_spill]] %s1988_s0 }
   0x2   :  { %2001 = sst [smem:[#allocation18_spill]] %s1990_s2 }
   0x3   :  { %11 = vsyncpa [#allocation5], 0 }
   0x4   :  { %13 = vsyncpa [#allocation5 + $0x1], 0 }
   0x5   :  { %14 = vsyncpa [#allocation8], 0 }
   0x6   :  { %15 = vsyncpa [#allocation6], 0 }
   0x7   :  { %17 = vsyncpa [#allocation6 + $0x1], 0  ;;  %s1349_s18 = smov 0   ;;  %s1351_s19 = smov 0  }
   0x8   :  { %s1353_s20 = smov 0   ;;  %s1355_s21 = smov 0  }
   0x9   :  { %s1357_s22 = smov 0   ;;  %s1359_s23 = smov 0  }
   0xa LB: > { %2002 = sst [smem:[#allocation15_spill]] %s1302_s22  ;;  %s35_s24 = sadd.s32 1, %s1302_s22  ;;  %s1306_s23 = sphi %s1359_s23, %s23_s23   ;;  %s1302_s22 = sphi %s1357_s22, %s2026_s22   ;;  %s1298_s21 = sphi %s1355_s21, %s2025_s21   ;;  %s1294_s20 = sphi %s1353_s20, %s2029_s20   ;;  %s1290_s19 = sphi %s1351_s19, %s2028_s19   ;;  %s1286_s18 = sphi %s1349_s18, %s2027_s18  }
   0xb   : > { %s44_s25 = sadd.s32 1, %s1294_s20  ;;  %p37_p0 = scmp.ge.s32.totalorder %s35_s24, 2 }
   0xc   : > { %p51_p1 = scmp.ne.s32.totalorder %s1294_s20, %s1290_s19  ;;  %p52_p2 = scmp.eq.s32.totalorder %s1306_s23, 0 }
   0xd   : > { %s2031_s24 = smov (%p37_p0, %s35_s24), 0  ;;  %p1069_p5 = scmp.lt.s32.totalorder %s1306_s23, 2 }
   0xe   : > { %2003 = sst [smem:[#allocation16_spill]] %s2031_s24  ;;  %p53_p4 = por %p52_p2, %p51_p1 }
   0xf   : > { %s39_s26 = ssub.s32 %s1302_s22, %s2031_s24  ;;  %s223_s27 = sand.u32 1, %s1306_s23  }
  0x10   : > { %p42_p6 = scmp.eq.s32.totalorder %s39_s26, 0  ;;  %s225_s28 = sand.u32 1, %s1294_s20  }
  0x11   : > { %s887_s29 = sshll.u32 %s1302_s22, 4  ;;  %s2004_s0 = sld [smem:[#allocation17_spill]] }
  0x12   : > { %s1397_s30 = scalar_select %p42_p6, %s1294_s20, %s44_s25  }
  0x13   : > { %s226_s9 = scalar_lea.vmem [#allocation4], %s225_s28  ;;  %p1404_p7 = pnand %p1069_p5, %p53_p4 }
  0x14   : > { %s234_s10 = sshll.u32 %s226_s9, 4  ;;  %s1410_s12 = sshll.u32 %s225_s28, 5  ;;  %s1408_s10 = int_to_ptr.vmem [resolvable:$true] %s234_s10 }
  0x15   : > { %s1412_s13 = scalar_lea.sflag [#allocation5], %s223_s27  ;;  %p1130_p9 = pneg %p1404_p7 }
  0x17   : > { %s1402_s8 = scalar_lea.hbm %s2004_s0, %s887_s29  ;;  %s1133_s17 = scalar_lea.hbm %s2004_s0, 32 }
  0x18   : > { %s1128_s14 = scalar_lea.hbm %s1402_s8, 16  ;;  %p1134_p12 = scmp.lt.u32.totalorder %s1402_s8, %s2004_s0 }
  0x19   : > { %p1129_p8 = scmp.ne.s32.totalorder %s1402_s8, %s1128_s14  ;;  %p1135_p13 = scmp.lt.u32.totalorder %s1133_s17, %s1128_s14 }
  0x1a   : > { %p1137_p2 = scmp.lt.u32.totalorder %s1128_s14, %s1402_s8 }
  0x1b   : > { %p1131_p10 = pnand %p1130_p9, %p1129_p8  ;;  %p1136_p0 = por %p1135_p13, %p1134_p12 }
  0x1d   : > { %p1132_p11 = pneg %p1131_p10  ;;  %p1138_p4 = por %p1137_p2, %p1136_p0 }
  0x1f   : > { %p1139_p5 = pnand %p1138_p4, %p1132_p11 }
  0x21   : > { %1142 = shalt.err (!%p1139_p5)
}
  0x22   : > { %s1143_s27 = scalar_lea.vmem %s1408_s10, 16  ;;  %s1308_s28 = smov [#allocation4]  }
  0x23   : > { %p1144_p6 = scmp.ne.s32.totalorder %s1408_s10, %s1143_s27  ;;  %s1148_s29 = sshll.u32 %s1308_s28, 4  ;;  %s1149_s29 = int_to_ptr.vmem [resolvable:$false] %s1148_s29 }
  0x24   : > { %s1150_s6 = scalar_lea.vmem %s1149_s29, 32  ;;  %p1151_p3 = scmp.lt.s32.totalorder %s1408_s10, %s1149_s29 }
  0x25   : > { %p1146_p8 = pnand %p1144_p6, %p1130_p9  ;;  %p1152_p12 = scmp.lt.s32.totalorder %s1150_s6, %s1143_s27 }
  0x27   : > { %p1147_p10 = pneg %p1146_p8  ;;  %p1153_p13 = por %p1152_p12, %p1151_p3 }
  0x29   : > { %p1154_p0 = pnand %p1153_p13, %p1147_p10 }
  0x2b   : > { %1157 = shalt.err (!%p1154_p0)
}
  0x2c   : > { %1060 = dma.hbm_to_vmem [thread:$0]  (!%p1404_p7), %s1402_s8, 16, %s1408_s10, %s1412_s13  }
  0x2d   : > { %s934_s7 = sshll.u32 %s1302_s22, 9  ;;  %s245_s9 = scalar_lea.vmem [#allocation9], %s1410_s12 }
  0x2e   : > { %s253_s14 = sshll.u32 %s245_s9, 4  ;;  %s1443_s15 = sadd.s32 4294967295, %s1306_s23   ;;  %s1469_s14 = int_to_ptr.vmem [resolvable:$true] %s253_s14 }
  0x2f   : > { %s883_s16 = sadd.s32 4294967294, %s1306_s23   ;;  %p57_p3 = scmp.ne.s32.totalorder %s1290_s19, %s1286_s18 }
  0x30   : > { %p1994_p11 = scmp.eq.s32.totalorder %s1443_s15, 0  ;;  %p132_p2 = scmp.eq.s32.totalorder %s1443_s15, 1 }
  0x31   : > { %p138_p4 = scmp.eq.s32.totalorder %s883_s16, 1  ;;  %p884_p5 = scmp.ge.s32.totalorder %s1306_s23, 1 }
  0x32   : > { %p1453_p6 = por %p1994_p11, %p57_p3  ;;  %p1460_p8 = por %p132_p2, %p51_p1 }
  0x33   : > { %p1464_p10 = por %p138_p4, %p57_p3  ;;  %p197_p12 = scmp.lt.s32.totalorder %s1306_s23, 3 }
  0x34   : > { %s2006_s17 = scalar_select %p1453_p6, 1, 0 }
  0x35   : > { %s2007_s8 = scalar_select %p1460_p8, 1, 0 }
  0x36   : > { %s2008_s10 = scalar_select %p1464_p10, 1, 0 }
  0x37   : > { %p1471_p13 = pnand %p884_p5, %p197_p12  ;;  %s1309_s25 = smov [#allocation7]  }
  0x38   : > { %s209_s26 = sshll.u32 %s1309_s25, 4  ;;  %s2010_s2 = sld [smem:[#allocation18_spill]]  ;;  %s1482_s26 = int_to_ptr.vmem [resolvable:$true] %s209_s26 }
  0x39   : > { %s2009_s12 = scalar_select %p1471_p13, 1, 0 }
  0x3a   : > { %p1053_p0 = pneg %p1471_p13 }
  0x3c   : > { %p1486_p1 = pnand %p1053_p0, %p1994_p11 }
  0x3e   : > { %s1480_s29 = scalar_lea.hbm %s2010_s2, %s934_s7  ;;  %s1163_s25 = scalar_lea.hbm %s2010_s2, 1024 }
  0x3f   : > { %s1158_s9 = scalar_lea.hbm %s1480_s29, 512  ;;  %p1164_p5 = scmp.lt.u32.totalorder %s1480_s29, %s2010_s2 }
  0x40   : > { %p1159_p3 = scmp.ne.s32.totalorder %s1480_s29, %s1158_s9  ;;  %p1165_p12 = scmp.lt.u32.totalorder %s1163_s25, %s1158_s9 }
  0x41   : > { %p1167_p0 = scmp.lt.u32.totalorder %s1158_s9, %s1480_s29 }
  0x42   : > { %p1161_p2 = pnand %p1159_p3, %p1130_p9  ;;  %p1166_p10 = por %p1165_p12, %p1164_p5 }
  0x44   : > { %p1162_p4 = pneg %p1161_p2  ;;  %p1168_p11 = por %p1167_p0, %p1166_p10 }
  0x46   : > { %p1169_p8 = pnand %p1168_p11, %p1162_p4 }
  0x48   : > { %1172 = shalt.err (!%p1169_p8)
}
  0x49   : > { %s1173_s0 = scalar_lea.vmem %s1469_s14, 512  ;;  %s1310_s16 = smov [#allocation9]  }
  0x4a   : > { %p1174_p3 = scmp.ne.s32.totalorder %s1469_s14, %s1173_s0  ;;  %s1178_s7 = sshll.u32 %s1310_s16, 4  ;;  %s1179_s7 = int_to_ptr.vmem [resolvable:$false] %s1178_s7 }
  0x4b   : > { %s1180_s27 = scalar_lea.vmem %s1179_s7, 1024  ;;  %p1181_p13 = scmp.lt.s32.totalorder %s1469_s14, %s1179_s7 }
  0x4c   : > { %p1176_p2 = pnand %p1174_p3, %p1130_p9  ;;  %p1182_p5 = scmp.lt.s32.totalorder %s1180_s27, %s1173_s0 }
  0x4e   : > { %p1177_p6 = pneg %p1176_p2  ;;  %p1183_p12 = por %p1182_p5, %p1181_p13 }
  0x50   : > { %p1184_p10 = pnand %p1183_p12, %p1177_p6 }
  0x52   : > { %1187 = shalt.err (!%p1184_p10)
}
  0x53   : > { %s1311_s9 = smov 128   ;;  %s1312_s25 = smov 8  }
  0x54   : > { %1063 = dma.hbm_to_vmem [thread:$0]  (!%p1404_p7), %s1480_s29, 512, %s1469_s14, %s1412_s13, %s1311_s9, %s1311_s9, %s1312_s25  }
  0x55   : > { %s1188_s16 = scalar_lea.hbm %s1989_s1, 512  ;;  %p1190_p11 = pneg %p1486_p1 }
  0x56   : > { %p1189_p9 = scmp.ne.s32.totalorder %s1989_s1, %s1188_s16  ;;  %p1195_p13 = scmp.lt.u32.totalorder %s1188_s16, %s1989_s1 }
  0x58   : > { %p1191_p6 = pnand %p1190_p11, %p1189_p9 }
  0x5a   : > { %p1192_p8 = pneg %p1191_p6 }
  0x5c   : > { %p1197_p4 = pnand %p1195_p13, %p1192_p8 }
  0x5e   : > { %1200 = shalt.err (!%p1197_p4)
}
  0x5f   : > { %s1201_s11 = scalar_lea.vmem %s1482_s26, 512  ;;  %p1209_p2 = scmp.lt.s32.totalorder %s1482_s26, %s1482_s26 }
  0x60   : > { %p1202_p7 = scmp.ne.s32.totalorder %s1482_s26, %s1201_s11  ;;  %p1210_p5 = scmp.lt.s32.totalorder %s1201_s11, %s1201_s11 }
  0x62   : > { %p1204_p0 = pnand %p1202_p7, %p1190_p11  ;;  %p1211_p12 = por %p1210_p5, %p1209_p2 }
  0x64   : > { %p1205_p3 = pneg %p1204_p0 }
  0x66   : > { %p1212_p10 = pnand %p1211_p12, %p1205_p3 }
  0x68   : > { %1215 = shalt.err (!%p1212_p10)
}
  0x69   : > { %1056 = dma.hbm_to_vmem [thread:$0]  (!%p1486_p1), %s1989_s1, 512, %s1482_s26, [#allocation8], %s1311_s9, %s1311_s9, %s1312_s25  }
  0x6a   : > { %p2012_p9 = scmp.ne.s32.totalorder %s2009_s12, 0 }
  0x6b   : > { %s267_s24 = sand.u32 (!%p2012_p9), 1, %s1443_s15   ;;  %s1539_s13 = sand.u32 (!%p2012_p9), 1, %s1290_s19  }
  0x6c   : > { %265 = sbr.rel (%p2012_p9) target bundleno = 558 (0x22e), region = 32  ;;  %s268_s14 = scalar_lea.sflag (!%p2012_p9), [#allocation5], %s267_s24 }
  0x6d   : > { %s270_s29 = scalar_lea.vmem (!%p2012_p9), [#allocation4], %s1539_s13  ;;  %p2013_p11 = scmp.ne.s32.totalorder (!%p2012_p9), %s2006_s17, 0 }
  0x73   : > { %1269 = dma.done.wait (%p2013_p11), %s268_s14, 16  }
  0x74   : > { %1271 = vsyncadd (%p2013_p11), %s268_s14, 4294967280  ;;  %p2014_p6 = scmp.eq.s32.totalorder %s1443_s15, 0 }
  0x76   : > { %1273 = dma.done.wait (%p2014_p6), [#allocation8], 512   ;;  %p2015_p1 = pmov %p2014_p6 }
  0x77   : > { %s893_s12 = sshll.u32 %s1539_s13, 5 }
  0x78   : > { %1275 = vsyncadd (%p2015_p1), [#allocation8], 4294966784  ;;  %s1553_s26 = scalar_lea.vmem [#allocation9], %s893_s12 }
  0x79   : > { %1277 = dma.done.wait (%p2013_p11), %s268_s14, 512  }
  0x7a   : > { %1279 = vsyncadd (%p2013_p11), %s268_s14, 4294966784  ;;  %v356_v0 = vlaneseq  ;;  %v1565_v6 = vld [vmem:[%s270_s29] sm:$0x1]  ;;  %v425_v10 = vld [vmem:[#allocation7] sm:$0xff]  ;;  %v1313_v13 = vmov 1.0|1.0  }
  0x7b   : > { %v427_v11 = vld [vmem:[#allocation7 + $0x10] sm:$0xff]  ;;  %989 = vmatprep.mubr.f32.mxu0 %v425_v10  ;;  %v1314_v16 = vmov 0.0   ;;  %v426_v31 = vld [vmem:[#allocation7 + $0x8] sm:$0xff]  ;;  %v428_v32 = vld [vmem:[#allocation7 + $0x18] sm:$0xff]  ;;  %p322_p8 = scmp.lt.s32.totalorder %s1298_s21, 1  ;;  %v1315_v51 = vmov 0  }
  0x7c   : > { %v1559_v1 = vshrl.u32 %v356_v0, 7  ;;  %992 = vmatprep.mubr.f32.mxu1 %v427_v11  ;;  %v601_v53 = vld [vmem:[%s1553_s26 + $0x8] sm:$0xff]  ;;  %v603_v54 = vld [vmem:[%s1553_s26 + $0x18] sm:$0xff]  ;;  %v600_v56 = vld [vmem:[%s1553_s26] sm:$0xff]  ;;  %s1838_s25 = scalar_lea.vmem [#allocation10], %s893_s12  ;;  %s936_s16 = sshll.u32 %s1298_s21, 9 }
  0x7d   : > { %s1809_s15 = scalar_select %p322_p8, %s1298_s21, 1  ;;  %v602_v57 = vld [vmem:[%s1553_s26 + $0x10] sm:$0xff] }
  0x7e   : > { %v375_v2 = vsub.s32 0, %v1559_v1  ;;  %v358_v3 = vadd.s32 8, %v1559_v1  ;;  %v359_v4 = vadd.s32 16, %v1559_v1  ;;  %v360_v5 = vadd.s32 24, %v1559_v1  ;;  %s719_s28 = sshll.u32 %s1838_s25, 4  ;;  %s1897_s11 = scalar_lea.hbm %s1991_s3, %s936_s16  ;;  %s1891_s28 = int_to_ptr.vmem [resolvable:$true] %s719_s28 }
  0x7f   : > { %v1573_v8 = vadd.s32 32, %v1559_v1  ;;  %v1576_v9 = vadd.s32 40, %v1559_v1  ;;  %v1587_v12 = vadd.s32 48, %v1559_v1  ;;  %v1604_v15 = vadd.s32 56, %v1559_v1  ;;  %s935_s17 = sshll.u32 %s1809_s15, 7  ;;  %s697_s2 = scalar_lea.sflag [#allocation6], %s1539_s13 }
  0x80   : > { %v1570_v7 = vrot.slane %v1565_v6, %v375_v2  ;;  %v1630_v20 = vadd.s32 64, %v1559_v1  ;;  %v1633_v21 = vadd.s32 72, %v1559_v1  ;;  %v1672_v25 = vadd.s32 80, %v1559_v1  ;;  %s1819_s9 = scalar_lea.vmem %s1992_s4, %s935_s17  ;;  %s1216_s22 = scalar_lea.vmem %s1891_s28, 512 }
  0x81   : > { %v1675_v26 = vadd.s32 88, %v1559_v1  ;;  %v1700_v27 = vadd.s32 96, %v1559_v1  ;;  %v1703_v28 = vadd.s32 104, %v1559_v1  ;;  %v1724_v29 = vadd.s32 112, %v1559_v1  ;;  %p1217_p13 = scmp.ne.s32.totalorder %s1891_s28, %s1216_s22  ;;  %p2022_p4 = scmp.ne.s32.totalorder %s2007_s8, 0 }
  0x82   : > { %vm377_vm0 = vcmp.eq.s32.totalorder %v1559_v1, %v1570_v7  ;;  %vm378_vm1 = vcmp.eq.s32.totalorder %v358_v3, %v1570_v7  ;;  %vm379_vm2 = vcmp.eq.s32.totalorder %v359_v4, %v1570_v7  ;;  %vm380_vm3 = vcmp.eq.s32.totalorder %v360_v5, %v1570_v7  ;;  %s1316_s24 = smov [#allocation10]  }
  0x83   : > { %vm995_vm4 = vmpackc.low %vm378_vm1, %vm377_vm0  ;;  %vm381_vm6 = vcmp.eq.s32.totalorder %v1573_v8, %v1570_v7  ;;  %vm382_vm7 = vcmp.eq.s32.totalorder %v1576_v9, %v1570_v7  ;;  %v898_v17 = vsel %vm378_vm1, 1.0, %v1314_v16  ;;  %v897_v18 = vsel %vm377_vm0, 1.0, %v1314_v16  ;;  %p1218_p7 = pnand %p1217_p13, %p2022_p4  ;;  %s1220_s14 = sshll.u32 %s1316_s24, 4  ;;  %s1221_s14 = int_to_ptr.vmem [resolvable:$false] %s1220_s14 }
  0x84   : > { %996 = vmatprep.subr.msk.bf16.mxu0 %vm995_vm4, %v1313_v13  ;;  %1027 = vmatprep.subr.msk.bf16.mxu1 %vm995_vm4, %v1313_v13  ;;  %vm1595_vm5 = vmpackc.low %vm380_vm3, %vm379_vm2  ;;  %vm383_vm9 = vcmp.eq.s32.totalorder %v1587_v12, %v1570_v7  ;;  %vm384_vm10 = vcmp.eq.s32.totalorder %v1604_v15, %v1570_v7  ;;  %v900_v22 = vsel %vm380_vm3, 1.0, %v1314_v16  ;;  %v899_v23 = vsel %vm379_vm2, 1.0, %v1314_v16  ;;  %s1222_s29 = scalar_lea.vmem %s1221_s14, 1024  ;;  %p1223_p3 = scmp.lt.s32.totalorder %s1891_s28, %s1221_s14 }
  0x85   : > { %998 = vmatpush3.bf16.msk.msra.mxu0 %vm995_vm4, %v1313_v13  ;;  %1035 = vmatpush3.bf16.msk.msra.mxu1 %vm995_vm4, %v1313_v13  ;;  %vm1625_vm8 = vmpackc.low %vm382_vm7, %vm381_vm6  ;;  %vm385_vm12 = vcmp.eq.s32.totalorder %v1630_v20, %v1570_v7  ;;  %vm386_vm13 = vcmp.eq.s32.totalorder %v1633_v21, %v1570_v7  ;;  %vm387_vm15 = vcmp.eq.s32.totalorder %v1672_v25, %v1570_v7  ;;  %v1727_v30 = vadd.s32 120, %v1559_v1  ;;  %p1219_p0 = pneg %p1218_p7  ;;  %p1224_p2 = scmp.lt.s32.totalorder %s1222_s29, %s1216_s22 }
  0x86   : > { %1000 = vmatprep.subr.msk.bf16.mxu0 %vm1595_vm5, %v1313_v13  ;;  %1028 = vmatprep.subr.msk.bf16.mxu1 %vm1595_vm5, %v1313_v13  ;;  %vm1663_vm11 = vmpackc.low %vm384_vm10, %vm383_vm9  ;;  %vm388_vm0 = vcmp.eq.s32.totalorder %v1675_v26, %v1570_v7  ;;  %vm389_vm2 = vcmp.eq.s32.totalorder %v1700_v27, %v1570_v7  ;;  %vm390_vm3 = vcmp.eq.s32.totalorder %v1703_v28, %v1570_v7  ;;  %v902_v33 = vsel %vm382_vm7, 1.0, %v1314_v16 }
  0x87   : > { %536 = vadd.xlane.f32.xlu1 %v898_v17  ;;  %534 = vadd.xlane.f32.xlu0 %v897_v18  ;;  %vm1011_vm14 = vmpackc.low %vm386_vm13, %vm385_vm12  ;;  %v901_v34 = vsel %vm381_vm6, 1.0, %v1314_v16  ;;  %vm599_vm6 = vcmp.ge.s32.totalorder %v1565_v6, 0  ;;  %v904_v11 = vsel %vm384_vm10, 1.0, %v1314_v16  ;;  %v906_v18 = vsel %vm386_vm13, 1.0, %v1314_v16  ;;  %p1225_p5 = por %p1224_p2, %p1223_p3 }
  0x88   : > { %vm1015_vm1 = vmpackc.low %vm388_vm0, %vm387_vm15  ;;  %v612_v52 = vsel %vm599_vm6, 1, %v1315_v51  ;;  %v905_v15 = vsel %vm385_vm12, 1.0, %v1314_v16  ;;  %v908_v21 = vsel %vm388_vm0, 1.0, %v1314_v16  ;;  %v907_v20 = vsel %vm387_vm15, 1.0, %v1314_v16 }
  0x89   : > { %1002 = vmatpush3.bf16.msk.msra.mxu0 %vm1595_vm5, %v1313_v13  ;;  %1036 = vmatpush3.bf16.msk.msra.mxu1 %vm1595_vm5, %v1313_v13  ;;  %vm1019_vm4 = vmpackc.low %vm390_vm3, %vm389_vm2  ;;  %vm391_vm5 = vcmp.eq.s32.totalorder %v1724_v29, %v1570_v7  ;;  %v616_v55 = vrot.slane %v612_v52, %v375_v2  ;;  %v910_v24 = vsel %vm390_vm3, 1.0, %v1314_v16  ;;  %v909_v26 = vsel %vm389_vm2, 1.0, %v1314_v16  ;;  %p1226_p12 = pnand %p1225_p5, %p1219_p0 }
  0x8a   : > { %1004 = vmatprep.subr.msk.bf16.mxu0 %vm1625_vm8, %v1313_v13  ;;  %1029 = vmatprep.subr.msk.bf16.mxu1 %vm1625_vm8, %v1313_v13  ;;  %v911_v27 = vsel %vm391_vm5, 1.0, %v1314_v16 }
  0x8b   : > { %540 = vadd.xlane.f32.xlu1 %v900_v22  ;;  %538 = vadd.xlane.f32.xlu0 %v899_v23  ;;  %vm617_vm7 = vcmp.eq.s32.totalorder %v616_v55, 1 }
  0x8d   : > { %1006 = vmatpush3.bf16.msk.msra.mxu0 %vm1625_vm8, %v1313_v13  ;;  %1037 = vmatpush3.bf16.msk.msra.mxu1 %vm1625_vm8, %v1313_v13  ;;  %vm392_vm8 = vcmp.eq.s32.totalorder %v1727_v30, %v1570_v7 }
  0x8e   : > { %1008 = vmatprep.subr.msk.bf16.mxu0 %vm1663_vm11, %v1313_v13  ;;  %1030 = vmatprep.subr.msk.bf16.mxu1 %vm1663_vm11, %v1313_v13  ;;  %v912_v25 = vsel %vm392_vm8, 1.0, %v1314_v16 }
  0x8f   : > { %544 = vadd.xlane.f32.xlu1 %v902_v33  ;;  %542 = vadd.xlane.f32.xlu0 %v901_v34 }
  0x91   : > { %1010 = vmatpush3.bf16.msk.msra.mxu0 %vm1663_vm11, %v1313_v13  ;;  %1038 = vmatpush3.bf16.msk.msra.mxu1 %vm1663_vm11, %v1313_v13  ;;  %vm1023_vm11 = vmpackc.low %vm392_vm8, %vm391_vm5 }
  0x92   : > { %1012 = vmatprep.subr.msk.bf16.mxu0 %vm1011_vm14, %v1313_v13  ;;  %1031 = vmatprep.subr.msk.bf16.mxu1 %vm1011_vm14, %v1313_v13 }
  0x95   : > { %1014 = vmatpush3.bf16.msk.msra.mxu0 %vm1011_vm14, %v1313_v13  ;;  %1039 = vmatpush3.bf16.msk.msra.mxu1 %vm1011_vm14, %v1313_v13  ;;  %vm334_vm14 = vcmask 7168  }
  0x96   : > { %1016 = vmatprep.subr.msk.bf16.mxu0 %vm1015_vm1, %v1313_v13  ;;  %1032 = vmatprep.subr.msk.bf16.mxu1 %vm1015_vm1, %v1313_v13  ;;  %336 = vst.msk [vmem:[#allocation2 + $0x8] sm:$0xff] %vm334_vm14, %v1314_v16  ;;  %335 = vst.msk [vmem:[#allocation2] sm:$0xff] %vm334_vm14, %v1314_v16 }
  0x97   : > { %337 = vst.msk [vmem:[#allocation2 + $0x10] sm:$0xff] %vm334_vm14, %v1314_v16  ;;  %338 = vst.msk [vmem:[#allocation2 + $0x18] sm:$0xff] %vm334_vm14, %v1314_v16 }
  0x98   : > { %339 = vst.msk [vmem:[#allocation2 + $0x20] sm:$0xff] %vm334_vm14, %v1314_v16  ;;  %340 = vst.msk [vmem:[#allocation2 + $0x28] sm:$0xff] %vm334_vm14, %v1314_v16 }
  0x99   : > { %1018 = vmatpush3.bf16.msk.msra.mxu0 %vm1015_vm1, %v1313_v13  ;;  %1040 = vmatpush3.bf16.msk.msra.mxu1 %vm1015_vm1, %v1313_v13  ;;  %341 = vst.msk [vmem:[#allocation2 + $0x30] sm:$0xff] %vm334_vm14, %v1314_v16  ;;  %342 = vst.msk [vmem:[#allocation2 + $0x38] sm:$0xff] %vm334_vm14, %v1314_v16 }
  0x9a   : > { %1020 = vmatprep.subr.msk.bf16.mxu0 %vm1019_vm4, %v1313_v13  ;;  %1033 = vmatprep.subr.msk.bf16.mxu1 %vm1019_vm4, %v1313_v13  ;;  %343 = vst.msk [vmem:[#allocation2 + $0x40] sm:$0xff] %vm334_vm14, %v1314_v16  ;;  %344 = vst.msk [vmem:[#allocation2 + $0x48] sm:$0xff] %vm334_vm14, %v1314_v16 }
  0x9b   : > { %345 = vst.msk [vmem:[#allocation2 + $0x50] sm:$0xff] %vm334_vm14, %v1314_v16  ;;  %346 = vst.msk [vmem:[#allocation2 + $0x58] sm:$0xff] %vm334_vm14, %v1314_v16 }
  0x9c   : > { %347 = vst.msk [vmem:[#allocation2 + $0x60] sm:$0xff] %vm334_vm14, %v1314_v16  ;;  %348 = vst.msk [vmem:[#allocation2 + $0x68] sm:$0xff] %vm334_vm14, %v1314_v16 }
  0x9d   : > { %1022 = vmatpush3.bf16.msk.msra.mxu0 %vm1019_vm4, %v1313_v13  ;;  %1041 = vmatpush3.bf16.msk.msra.mxu1 %vm1019_vm4, %v1313_v13  ;;  %349 = vst.msk [vmem:[#allocation2 + $0x70] sm:$0xff] %vm334_vm14, %v1314_v16  ;;  %350 = vst.msk [vmem:[#allocation2 + $0x78] sm:$0xff] %vm334_vm14, %v1314_v16  ;;  %v519_v39 = vld [vmem:[#allocation2 + $0x8] sm:$0xff]  ;;  %v518_v40 = vld [vmem:[#allocation2] sm:$0xff] }
  0x9e   : > { %1024 = vmatprep.subr.msk.bf16.mxu0 %vm1023_vm11, %v1313_v13  ;;  %1034 = vmatprep.subr.msk.bf16.mxu1 %vm1023_vm11, %v1313_v13  ;;  %351 = vst.msk [vmem:[#allocation3] sm:$0xff] %vm334_vm14, %v1314_v16  ;;  %352 = vst.msk [vmem:[#allocation3 + $0x8] sm:$0xff] %vm334_vm14, %v1314_v16  ;;  %v521_v41 = vld [vmem:[#allocation2 + $0x18] sm:$0xff]  ;;  %v520_v45 = vld [vmem:[#allocation2 + $0x10] sm:$0xff] }
  0x9f   : > { %353 = vst.msk [vmem:[#allocation3 + $0x10] sm:$0xff] %vm334_vm14, %v1314_v16  ;;  %354 = vst.msk [vmem:[#allocation3 + $0x18] sm:$0xff] %vm334_vm14, %v1314_v16  ;;  %v523_v14 = vld [vmem:[#allocation2 + $0x28] sm:$0xff]  ;;  %v522_v17 = vld [vmem:[#allocation2 + $0x20] sm:$0xff] }
  0xa1   : > { %1026 = vmatpush3.bf16.msk.msra.mxu0 %vm1023_vm11, %v1313_v13  ;;  %1042 = vmatpush3.bf16.msk.msra.mxu1 %vm1023_vm11, %v1313_v13  ;;  %v903_v13 = vsel %vm383_vm9, 1.0, %v1314_v16 }
  0xa4   : > { %990 = vmatmul.mubr.f32.vlgmr.msra.gmra.mrb[0].mxu0 %v426_v31  ;;  %993 = vmatmul.mubr.f32.vlgmr.msra.gmra.mrb[0].mxu1 %v428_v32 }
 0x114   : > { %v537_v35 = vpop.xlane.xlu1 %536  ;;  %v535_v36 = vpop.xlane.xlu0 %534 }
 0x115   : > { %v567_v42 = vadd.f32 %v537_v35, %v519_v39  ;;  %v566_v43 = vadd.f32 %v535_v36, %v518_v40 }
 0x117   : > { %584 = vst.msk [vmem:[#allocation2 + $0x8] sm:$0xff] %vm334_vm14, %v567_v42  ;;  %583 = vst.msk [vmem:[#allocation2] sm:$0xff] %vm334_vm14, %v566_v43 }
 0x118   : > { %v541_v37 = vpop.xlane.xlu1 %540  ;;  %v539_v38 = vpop.xlane.xlu0 %538 }
 0x119   : > { %v569_v44 = vadd.f32 %v541_v37, %v521_v41  ;;  %v568_v46 = vadd.f32 %v539_v38, %v520_v45 }
 0x11b   : > { %586 = vst.msk [vmem:[#allocation2 + $0x18] sm:$0xff] %vm334_vm14, %v569_v44  ;;  %585 = vst.msk [vmem:[#allocation2 + $0x10] sm:$0xff] %vm334_vm14, %v568_v46 }
 0x11c   : > { %v545_v19 = vpop.xlane.xlu1 %544  ;;  %v543_v22 = vpop.xlane.xlu0 %542 }
 0x11d   : > { %v571_v23 = vadd.f32 %v545_v19, %v523_v14  ;;  %v570_v12 = vadd.f32 %v543_v22, %v522_v17 }
 0x11e   : > { %v646_v47 = vld [vmem:[#allocation2 + $0x8] sm:$0xff]  ;;  %v645_v48 = vld [vmem:[#allocation2] sm:$0xff] }
 0x11f   : > { %662 = vst.msk [vmem:[%s1819_s9 + $0x8] sm:$0xff] %vm334_vm14, %v646_v47  ;;  %661 = vst.msk [vmem:[%s1819_s9] sm:$0xff] %vm334_vm14, %v645_v48 }
 0x120   : > { %588 = vst.msk [vmem:[#allocation2 + $0x28] sm:$0xff] %vm334_vm14, %v571_v23  ;;  %587 = vst.msk [vmem:[#allocation2 + $0x20] sm:$0xff] %vm334_vm14, %v570_v12 }
 0x122   : > { %v648_v49 = vld [vmem:[#allocation2 + $0x18] sm:$0xff]  ;;  %v647_v50 = vld [vmem:[#allocation2 + $0x10] sm:$0xff] }
 0x123   : > { %664 = vst.msk [vmem:[%s1819_s9 + $0x18] sm:$0xff] %vm334_vm14, %v648_v49  ;;  %663 = vst.msk [vmem:[%s1819_s9 + $0x10] sm:$0xff] %vm334_vm14, %v647_v50 }
 0x127   : > { %v650_v31 = vld [vmem:[#allocation2 + $0x28] sm:$0xff]  ;;  %v649_v32 = vld [vmem:[#allocation2 + $0x20] sm:$0xff] }
 0x128   : > { %666 = vst.msk [vmem:[%s1819_s9 + $0x28] sm:$0xff] %vm334_vm14, %v650_v31  ;;  %665 = vst.msk [vmem:[%s1819_s9 + $0x20] sm:$0xff] %vm334_vm14, %v649_v32 }
 0x177   : > { %v991_v58 = vpop.f32.mrb[0].mxu0  ;;  %v994_v59 = vpop.f32.mrb[0].mxu1 }
 0x178   : > { %515 = vst [vmem:[%s1838_s25 + $0x8] sm:$0xff] %v991_v58  ;;  %v605_v60 = vsub.f32 %v991_v58, %v601_v53  ;;  %517 = vst [vmem:[%s1838_s25 + $0x18] sm:$0xff] %v994_v59  ;;  %v607_v61 = vsub.f32 %v994_v59, %v603_v54  ;;  %v495_v62 = vpop.f32.mrb[1].mxu0  ;;  %v505_v63 = vpop.f32.mrb[1].mxu1 }
 0x179   : > { %514 = vst [vmem:[%s1838_s25] sm:$0xff] %v495_v62  ;;  %v604_v0 = vsub.f32 %v495_v62, %v600_v56  ;;  %516 = vst [vmem:[%s1838_s25 + $0x10] sm:$0xff] %v505_v63  ;;  %v606_v1 = vsub.f32 %v505_v63, %v602_v57 }
 0x17a   : > { %v609_v2 = vmul.f32 %v605_v60, %v605_v60  ;;  %v611_v3 = vmul.f32 %v607_v61, %v607_v61 }
 0x17b   : > { %v608_v4 = vmul.f32 %v604_v0, %v604_v0  ;;  %v610_v5 = vmul.f32 %v606_v1, %v606_v1 }
 0x17c   : > { %v621_v6 = vsel %vm617_vm7, %v611_v3, 0.0  ;;  %v619_v8 = vsel %vm617_vm7, %v609_v2, 0.0 }
 0x17d   : > { %632 = vadd.xlane.f32.xlu1 %v621_v6  ;;  %628 = vadd.xlane.f32.xlu0 %v619_v8  ;;  %v620_v9 = vsel %vm617_vm7, %v610_v5, 0.0  ;;  %v618_v10 = vsel %vm617_vm7, %v608_v4, 0.0 }
 0x181   : > { %630 = vadd.xlane.f32.xlu1 %v620_v9  ;;  %626 = vadd.xlane.f32.xlu0 %v618_v10 }
 0x185   : > { %548 = vadd.xlane.f32.xlu1 %v904_v11  ;;  %546 = vadd.xlane.f32.xlu0 %v903_v13 }
 0x189   : > { %552 = vadd.xlane.f32.xlu1 %v906_v18  ;;  %550 = vadd.xlane.f32.xlu0 %v905_v15 }
 0x18d   : > { %556 = vadd.xlane.f32.xlu1 %v908_v21  ;;  %554 = vadd.xlane.f32.xlu0 %v907_v20 }
 0x191   : > { %560 = vadd.xlane.f32.xlu1 %v910_v24  ;;  %558 = vadd.xlane.f32.xlu0 %v909_v26 }
 0x195   : > { %564 = vadd.xlane.f32.xlu1 %v912_v25  ;;  %562 = vadd.xlane.f32.xlu0 %v911_v27 }
 0x196   : > { %1229 = shalt.err (!%p1226_p12)
}
 0x197   : > { %s1230_s21 = scalar_lea.hbm %s1897_s11, 512  ;;  %s1234_s17 = scalar_lea.hbm %s1991_s3, 1024 }
 0x198   : > { %p1231_p10 = scmp.ne.s32.totalorder %s1897_s11, %s1230_s21  ;;  %p1235_p6 = scmp.lt.u32.totalorder %s1897_s11, %s1991_s3 }
 0x199   : > { %p1236_p1 = scmp.lt.u32.totalorder %s1234_s17, %s1230_s21  ;;  %p1238_p13 = scmp.lt.u32.totalorder %s1230_s21, %s1897_s11 }
 0x19a   : > { %p1232_p9 = pnand %p1231_p10, %p2022_p4 }
 0x19b   : > { %p1237_p8 = por %p1236_p1, %p1235_p6 }
 0x19c   : > { %p1233_p11 = pneg %p1232_p9 }
 0x19d   : > { %p1239_p7 = por %p1238_p13, %p1237_p8 }
 0x19f   : > { %p1240_p0 = pnand %p1239_p7, %p1233_p11 }
 0x1a1   : > { %1243 = shalt.err (!%p1240_p0)
}
 0x1a2   : > { %s1317_s25 = smov 128   ;;  %s1318_s16 = smov 8   ;;  %v625_v7 = vld [vmem:[#allocation3 + $0x18] sm:$0xff]  ;;  %v623_v16 = vld [vmem:[#allocation3 + $0x8] sm:$0xff]  ;;  %v624_v34 = vld [vmem:[#allocation3 + $0x10] sm:$0xff]  ;;  %vm694_vm9 = vcmask 0  }
 0x1a3   : > { %1051 = dma.vmem_to_hbm [thread:$0]  (%p2022_p4), %s1891_s28, 512, %s1897_s11, %s697_s2, %s1317_s25, %s1317_s25, %s1318_s16   ;;  %v622_v35 = vld [vmem:[#allocation3] sm:$0xff]  ;;  %v525_v40 = vld [vmem:[#allocation2 + $0x38] sm:$0xff]  ;;  %v524_v41 = vld [vmem:[#allocation2 + $0x30] sm:$0xff] }
 0x1a4   : > { %v527_v46 = vld [vmem:[#allocation2 + $0x48] sm:$0xff]  ;;  %v526_v47 = vld [vmem:[#allocation2 + $0x40] sm:$0xff]  ;;  %v529_v53 = vld [vmem:[#allocation2 + $0x58] sm:$0xff]  ;;  %s329_s28 = scalar_lea.vmem %s1993_s5, %s1809_s15 }
 0x1a5   : > { %v528_v56 = vld [vmem:[#allocation2 + $0x50] sm:$0xff]  ;;  %v531_v2 = vld [vmem:[#allocation2 + $0x68] sm:$0xff]  ;;  %v530_v6 = vld [vmem:[#allocation2 + $0x60] sm:$0xff] }
 0x1a6   : > { %v533_v17 = vld [vmem:[#allocation2 + $0x78] sm:$0xff]  ;;  %v532_v22 = vld [vmem:[#allocation2 + $0x70] sm:$0xff] }
 0x20a   : > { %v633_v28 = vpop.xlane.xlu1 %632  ;;  %v629_v29 = vpop.xlane.xlu0 %628 }
 0x20b   : > { %v637_v30 = vadd.f32 %v633_v28, %v625_v7  ;;  %v635_v33 = vadd.f32 %v629_v29, %v623_v16 }
 0x20d   : > { %641 = vst.msk [vmem:[#allocation3 + $0x18] sm:$0xff] %vm334_vm14, %v637_v30  ;;  %639 = vst.msk [vmem:[#allocation3 + $0x8] sm:$0xff] %vm334_vm14, %v635_v33 }
 0x20e   : > { %v631_v36 = vpop.xlane.xlu1 %630  ;;  %v627_v37 = vpop.xlane.xlu0 %626 }
 0x20f   : > { %v636_v38 = vadd.f32 %v631_v36, %v624_v34  ;;  %v634_v39 = vadd.f32 %v627_v37, %v622_v35 }
 0x211   : > { %640 = vst.msk [vmem:[#allocation3 + $0x10] sm:$0xff] %vm334_vm14, %v636_v38  ;;  %638 = vst.msk [vmem:[#allocation3] sm:$0xff] %vm334_vm14, %v634_v39 }
 0x212   : > { %v549_v42 = vpop.xlane.xlu1 %548  ;;  %v547_v43 = vpop.xlane.xlu0 %546 }
 0x213   : > { %v573_v44 = vadd.f32 %v549_v42, %v525_v40  ;;  %v572_v45 = vadd.f32 %v547_v43, %v524_v41 }
 0x214   : > { %v678_v48 = vld [vmem:[#allocation3 + $0x8] sm:$0xff]  ;;  %v680_v59 = vld [vmem:[#allocation3 + $0x18] sm:$0xff] }
 0x215   : > { %590 = vst.msk [vmem:[#allocation2 + $0x38] sm:$0xff] %vm334_vm14, %v573_v44  ;;  %589 = vst.msk [vmem:[#allocation2 + $0x30] sm:$0xff] %vm334_vm14, %v572_v45  ;;  %v682_v57 = vsel %vm334_vm14, %v678_v48, 0.0  ;;  %v686_v8 = vsel %vm334_vm14, %v680_v59, 0.0 }
 0x216   : > { %v553_v49 = vpop.xlane.xlu1 %552  ;;  %v551_v50 = vpop.xlane.xlu0 %550 }
 0x217   : > { %v575_v51 = vadd.f32 %v553_v49, %v527_v46  ;;  %v574_v52 = vadd.f32 %v551_v50, %v526_v47 }
 0x218   : > { %v679_v54 = vld [vmem:[#allocation3 + $0x10] sm:$0xff]  ;;  %v677_v55 = vld [vmem:[#allocation3] sm:$0xff] }
 0x219   : > { %v681_v58 = vsel %vm334_vm14, %v677_v55, 0.0  ;;  %592 = vst.msk [vmem:[#allocation2 + $0x48] sm:$0xff] %vm334_vm14, %v575_v51  ;;  %591 = vst.msk [vmem:[#allocation2 + $0x40] sm:$0xff] %vm334_vm14, %v574_v52  ;;  %v684_v63 = vsel %vm334_vm14, %v679_v54, 0.0 }
 0x21a   : > { %v683_v60 = vadd.f32 %v682_v57, %v681_v58  ;;  %v557_v61 = vpop.xlane.xlu1 %556  ;;  %v555_v62 = vpop.xlane.xlu0 %554 }
 0x21b   : > { %v577_v0 = vadd.f32 %v557_v61, %v529_v53  ;;  %v576_v1 = vadd.f32 %v555_v62, %v528_v56 }
 0x21c   : > { %v685_v3 = vadd.f32 %v684_v63, %v683_v60  ;;  %v652_v4 = vld [vmem:[#allocation2 + $0x38] sm:$0xff]  ;;  %v651_v5 = vld [vmem:[#allocation2 + $0x30] sm:$0xff] }
 0x21d   : > { %668 = vst.msk [vmem:[%s1819_s9 + $0x38] sm:$0xff] %vm334_vm14, %v652_v4  ;;  %667 = vst.msk [vmem:[%s1819_s9 + $0x30] sm:$0xff] %vm334_vm14, %v651_v5 }
 0x21e   : > { %594 = vst.msk [vmem:[#allocation2 + $0x58] sm:$0xff] %vm334_vm14, %v577_v0  ;;  %593 = vst.msk [vmem:[#allocation2 + $0x50] sm:$0xff] %vm334_vm14, %v576_v1  ;;  %v687_v9 = vadd.f32 %v686_v8, %v685_v3  ;;  %v561_v10 = vpop.xlane.xlu1 %560  ;;  %v559_v11 = vpop.xlane.xlu0 %558 }
 0x21f   : > { %v579_v13 = vadd.f32 %v561_v10, %v531_v2  ;;  %v578_v14 = vadd.f32 %v559_v11, %v530_v6 }
 0x220   : > { %v688_v18 = vrot.slane %v687_v9, 4  ;;  %v654_v15 = vld [vmem:[#allocation2 + $0x48] sm:$0xff]  ;;  %v653_v19 = vld [vmem:[#allocation2 + $0x40] sm:$0xff] }
 0x221   : > { %670 = vst.msk [vmem:[%s1819_s9 + $0x48] sm:$0xff] %vm334_vm14, %v654_v15  ;;  %669 = vst.msk [vmem:[%s1819_s9 + $0x40] sm:$0xff] %vm334_vm14, %v653_v19 }
 0x222   : > { %596 = vst.msk [vmem:[#allocation2 + $0x68] sm:$0xff] %vm334_vm14, %v579_v13  ;;  %595 = vst.msk [vmem:[#allocation2 + $0x60] sm:$0xff] %vm334_vm14, %v578_v14  ;;  %v689_v23 = vadd.f32 %v688_v18, %v687_v9  ;;  %v565_v12 = vpop.xlane.xlu1 %564  ;;  %v563_v21 = vpop.xlane.xlu0 %562 }
 0x223   : > { %v581_v20 = vadd.f32 %v565_v12, %v533_v17  ;;  %v580_v24 = vadd.f32 %v563_v21, %v532_v22 }
 0x224   : > { %v690_v26 = vrot.slane %v689_v23, 2 }
 0x225   : > { %v656_v31 = vld [vmem:[#allocation2 + $0x58] sm:$0xff]  ;;  %v655_v32 = vld [vmem:[#allocation2 + $0x50] sm:$0xff]  ;;  %598 = vst.msk [vmem:[#allocation2 + $0x78] sm:$0xff] %vm334_vm14, %v581_v20  ;;  %597 = vst.msk [vmem:[#allocation2 + $0x70] sm:$0xff] %vm334_vm14, %v580_v24 }
 0x226   : > { %672 = vst.msk [vmem:[%s1819_s9 + $0x58] sm:$0xff] %vm334_vm14, %v656_v31  ;;  %671 = vst.msk [vmem:[%s1819_s9 + $0x50] sm:$0xff] %vm334_vm14, %v655_v32  ;;  %v691_v25 = vadd.f32 %v690_v26, %v689_v23 }
 0x228   : > { %v692_v27 = vrot.slane %v691_v25, 1 }
 0x229   : > { %v658_v7 = vld [vmem:[#allocation2 + $0x68] sm:$0xff]  ;;  %v657_v16 = vld [vmem:[#allocation2 + $0x60] sm:$0xff] }
 0x22a   : > { %674 = vst.msk [vmem:[%s1819_s9 + $0x68] sm:$0xff] %vm334_vm14, %v658_v7  ;;  %673 = vst.msk [vmem:[%s1819_s9 + $0x60] sm:$0xff] %vm334_vm14, %v657_v16  ;;  %v693_v28 = vadd.f32 %v692_v27, %v691_v25 }
 0x22c   : > { %695 = vst.msk [vmem:[%s329_s28] sm:$0x1] %vm694_vm9, %v693_v28  ;;  %v660_v29 = vld [vmem:[#allocation2 + $0x78] sm:$0xff]  ;;  %v659_v30 = vld [vmem:[#allocation2 + $0x70] sm:$0xff] }
 0x22d   : > { %676 = vst.msk [vmem:[%s1819_s9 + $0x78] sm:$0xff] %vm334_vm14, %v660_v29  ;;  %675 = vst.msk [vmem:[%s1819_s9 + $0x70] sm:$0xff] %vm334_vm14, %v659_v30 }
 0x22e PF: > { %s740_s0 = sand.u32 1, %s1286_s18   ;;  %p2023_p4 = scmp.ne.s32.totalorder %s2008_s10, 0 }
 0x22f   : > { %p2024_p3 = scmp.ge.s32.totalorder %s1306_s23, 2  ;;  %s741_s15 = scalar_lea.sflag [#allocation6], %s740_s0 }
 0x231   : > { %p1065_p2 = pnand %p2024_p3, %p2023_p4 }
 0x233   : > { %1281 = dma.done.wait (!%p1065_p2), %s741_s15, 512  }
 0x234   : > { %1283 = vsyncadd (!%p1065_p2), %s741_s15, 4294966784  ;;  %s23_s23 = sadd.s32 1, %s1306_s23   ;;  %s2025_s21 = sld [smem:[#allocation15_spill]] }
 0x235   : > { %p20_p5 = scmp.ge.s32.totalorder %s23_s23, 4   ;;  %s2026_s22 = sld [smem:[#allocation16_spill]] }
 0x236   : > { %s2027_s18 = smov %s1290_s19  ;;  %s2028_s19 = smov %s1294_s20 }
 0x237   : > { %s2029_s20 = smov %s1397_s30  ;;  %22 = sbr.rel (!%p20_p5) target bundleno = 10 (0xa), region = 124 }
 0x23e   :  { %760 = vsyncpa [#allocation5], 1 }
 0x23f   :  { %762 = vsyncpa [#allocation5 + $0x1], 1 }
 0x240   :  { %763 = vsyncpa [#allocation8], 1 }
 0x241   :  { %764 = vsyncpa [#allocation6], 1 }
 0x242   :  { %766 = vsyncpa [#allocation6 + $0x1], 1 }

</bundles_post_ra>
